<compile_context>
chip_gen: v6e
topology: v6e:2x2x1
jax: 0.10.0
libtpu: 0.0.40
codegen_flags: <defaults>
</compile_context>

<pallas_src>
import functools
import math

import jax
import jax.numpy as jnp
from jax.experimental import pallas as pl
from jax.experimental.pallas import tpu as pltpu

_EPS = 1e-11
_DEG_PER_RAD = 180.0 / math.pi

# Abramowitz & Stegun 4.4.46: acos(x) ~= sqrt(1-x) * poly(x) for 0<=x<=1.
_ACOS_COEFFS = (
    1.5707963050, -0.2145988016, 0.0889789874, -0.0501743046,
    0.0308918810, -0.0170881256, 0.0066700901, -0.0012624911,
)


def _acos_poly(x):
    """float32 arccos from abs/mul/add/sqrt/select only (Pallas-TPU safe)."""
    ax = jnp.abs(x)
    p = jnp.float32(_ACOS_COEFFS[-1])
    for c in _ACOS_COEFFS[-2::-1]:
        p = p * ax + jnp.float32(c)
    r = jnp.sqrt(jnp.maximum(1.0 - ax, 0.0)) * p
    return jnp.where(x < 0.0, jnp.float32(math.pi) - r, r)


def _sam_kernel(x_ref, y_ref, o_ref, *, n_valid, scale, needs_mask):
    # x_ref, y_ref : (C, ts, 128)  source dtype  -- rows on sublanes, pixels on lanes
    # o_ref        : (sub, 128)    f32           -- per-(batch,split) partial, resident
    s = pl.program_id(1)
    t = pl.program_id(2)

    @pl.when(t == 0)
    def _init():
        o_ref[...] = jnp.zeros_like(o_ref)

    xa = x_ref[...].astype(jnp.float32)
    ya = y_ref[...].astype(jnp.float32)

    # Per-row reductions over the (small) leading C axis -> dense (ts, 128).
    mole = jnp.sum(xa * ya, axis=0)
    sxx = jnp.sum(xa * xa, axis=0)
    syy = jnp.sum(ya * ya, axis=0)

    # One sqrt + EUP reciprocal (approx) + one Newton step (restores ~f32 acc).
    denom = jnp.sqrt(sxx * syy) + jnp.float32(_EPS)
    inv = pl.reciprocal(denom, approx=True)
    inv = inv * (2.0 - denom * inv)
    ratio = (mole + jnp.float32(_EPS)) * inv
    ang = _acos_poly(ratio)                                   # (ts, 128) radians

    if needs_mask:
        # Discard lanes past the true pixel count (and fully-out-of-range
        # clamped blocks) with a select, so garbage/NaN cannot propagate.
        ts_rows, lanes = ang.shape
        base = (s * pl.num_programs(2) + t) * (ts_rows * lanes)
        row = jax.lax.broadcasted_iota(jnp.int32, ang.shape, 0)
        lane = jax.lax.broadcasted_iota(jnp.int32, ang.shape, 1)
        ang = jnp.where(base + row * lanes + lane < n_valid, ang, 0.0)

    # Tree-reduce (ts,128) -> (sub,128) with aligned static slices (pure VPU,
    # no cross-lane work in the inner loop).
    sub = o_ref.shape[0]
    parts = [ang[i * sub:(i + 1) * sub, :] for i in range(ang.shape[0] // sub)]
    while len(parts) > 1:
        nxt = [parts[i] + parts[i + 1] for i in range(0, len(parts) - 1, 2)]
        if len(parts) % 2:
            nxt.append(parts[-1])
        parts = nxt
    o_ref[...] += parts[0]

    @pl.when(t == pl.num_programs(2) - 1)
    def _finalize():
        o_ref[...] = o_ref[...] * jnp.float32(scale)


def sam_loss_pallas(x, y, *, target_block_bytes=1 << 20, block_rows=None):
    """samLoss.forward(x, y): mean spectral angle in degrees (scalar)."""
    assert x.shape == y.shape and x.ndim == 4
    B, C, H, W = x.shape
    N = H * W                      # rows per batch after .view(-1, C)
    ebytes = jnp.dtype(x.dtype).itemsize

    R = -(-N // 128)               # 128-pixel row-groups per image
    NP = R * 128

    # --- single wrapper layout pass, in the source dtype ----------------------
    # Faithful to torch's row-major .view(-1, C): group C consecutive flat
    # elements into a "row", then put rows on (sublane, lane) = (R, 128).
    xt = jnp.swapaxes(x.reshape(B, N, C), 1, 2)      # (B, C, N)
    yt = jnp.swapaxes(y.reshape(B, N, C), 1, 2)
    if NP != N:                                      # <=127-elem pad, fuses with transpose
        pad = ((0, 0), (0, 0), (0, NP - N))
        xt = jnp.pad(xt, pad)
        yt = jnp.pad(yt, pad)
    xq = xt.reshape(B, C, R, 128)
    yq = yt.reshape(B, C, R, 128)

    # --- block sizing by bytes -------------------------------------------------
    row_align = max(8, 32 // ebytes)                 # f32:8, bf16:16, 8-bit:32
    if block_rows is not None:
        budget_rows = int(block_rows)
    else:
        budget_rows = max(1, target_block_bytes // (ebytes * C * 128))
    if R <= row_align:
        ts = R                                       # one (partial-height) block
    else:
        ts = min(max(row_align, (budget_rows // row_align) * row_align),
                 -(-R // row_align) * row_align)
    sub = 8 if (ts >= 8 and ts % 8 == 0) else ts     # accumulator sublane height

    T = -(-R // ts)                                  # tiles per image
    splits = 2 if T >= 2 else 1                      # keep both v7x TCs busy when B==1
    tps = -(-T // splits)                            # tiles per split
    covered = splits * tps * ts * 128
    needs_mask = covered != N
    scale = _DEG_PER_RAD / N

    def in_index(b, s, t):
        blk = jnp.minimum(s * tps + t, T - 1)        # never map a fully-OOB block
        return (b, 0, blk, 0)

    in_spec = pl.BlockSpec((None, C, ts, 128), in_index)
    out_spec = pl.BlockSpec((None, None, sub, 128), lambda b, s, t: (b, s, 0, 0))

    kernel = functools.partial(_sam_kernel, n_valid=N, scale=scale,
                               needs_mask=needs_mask)

    cost = pl.CostEstimate(
        flops=int(B * N * (6 * C + 30)),
        transcendentals=int(2 * B * N),
        bytes_accessed=int(2 * B * C * N * ebytes + B * splits * sub * 128 * 4),
    )

    out = pl.pallas_call(
        kernel,
        grid=(B, splits, tps),
        in_specs=[in_spec, in_spec],
        out_specs=out_spec,
        out_shape=jax.ShapeDtypeStruct((B, splits, sub, 128), jnp.float32),
        compiler_params=pltpu.CompilerParams(
            dimension_semantics=("parallel", "parallel", "arbitrary")),
        cost_estimate=cost,
    )(xq, yq)

    # Each (b, split) block already holds (deg/N) * sum(angles in that split).
    per_batch = jnp.sum(out, axis=(1, 2, 3))         # (B,) mean SAM in degrees
    return jnp.mean(per_batch)


def sam_loss_reference(x, y):
    """Pure-JAX mirror of the PyTorch samLoss.forward."""
    B, C = x.shape[0], x.shape[1]
    total = jnp.float32(0.0)
    for i in range(B):
        a = x[i].reshape(-1, C).astype(jnp.float32)
        b = y[i].reshape(-1, C).astype(jnp.float32)
        mole = jnp.sum(a * b, axis=1)
        deno = jnp.sqrt(jnp.sum(a * a, axis=1)) * jnp.sqrt(jnp.sum(b * b, axis=1))
        sam = jnp.arccos((mole + _EPS) / (deno + _EPS)) * _DEG_PER_RAD
        total = total + jnp.mean(sam)
    return total / B


if __name__ == "__main__":
    key = jax.random.PRNGKey(0)
    ks = jax.random.split(key, 8)

    loss = jax.jit(sam_loss_pallas,
                   static_argnames=("target_block_bytes", "block_rows"))

    # 1) Main shape: B=2, C=4, 16x16 (N=256 -> exact fit, no masking).
    x = jax.random.uniform(ks[0], (2, 4, 16, 16), dtype=jnp.float32)
    y = jax.random.uniform(ks[1], (2, 4, 16, 16), dtype=jnp.float32)
    out = jax.block_until_ready(loss(x, y))
    ref = sam_loss_reference(x, y)
    assert abs(float(out) - float(ref)) < 5e-3, (float(out), float(ref))

    # 2) Masking path: B=2, C=3, 10x10 (N=100 -> padded row-group, masked lanes).
    x2 = jax.random.uniform(ks[2], (2, 3, 10, 10), dtype=jnp.float32)
    y2 = jax.random.uniform(ks[3], (2, 3, 10, 10), dtype=jnp.float32)
    out2 = jax.block_until_ready(loss(x2, y2))
    ref2 = sam_loss_reference(x2, y2)
    assert abs(float(out2) - float(ref2)) < 5e-3, (float(out2), float(ref2))

    # 3) Multi-tile + 2-way pixel split + clamped overhang block: C=4, 48x48.
    x3 = jax.random.uniform(ks[4], (2, 4, 48, 48), dtype=jnp.float32)
    y3 = jax.random.uniform(ks[5], (2, 4, 48, 48), dtype=jnp.float32)
    out3 = jax.block_until_ready(loss(x3, y3, block_rows=8))
    ref3 = sam_loss_reference(x3, y3)
    assert abs(float(out3) - float(ref3)) < 5e-3, (float(out3), float(ref3))

    # 4) bf16 inputs stream at half the HBM bytes (cast to f32 inside the kernel).
    xb = jax.random.uniform(ks[6], (2, 4, 16, 16), dtype=jnp.bfloat16)
    yb = jax.random.uniform(ks[7], (2, 4, 16, 16), dtype=jnp.bfloat16)
    outb = jax.block_until_ready(loss(xb, yb))
    refb = sam_loss_reference(xb, yb)
    assert abs(float(outb) - float(refb)) < 1e-2, (float(outb), float(refb))

    print("KERNEL_OK")
</pallas_src>

<mosaic_0001>
module attributes {stable_mosaic.version = 11 : i64} {
  func.func @_sam_kernel(%arg0: i32, %arg1: i32, %arg2: i32, %arg3: memref<1x4x2x128xf32, #tpu.memory_space<vmem>>, %arg4: memref<1x4x2x128xf32, #tpu.memory_space<vmem>>, %arg5: memref<1x1x2x128xf32, #tpu.memory_space<vmem>>) attributes {dimension_semantics = [#tpu.dimension_semantics<parallel>, #tpu.dimension_semantics<parallel>, #tpu.dimension_semantics<arbitrary>], iteration_bounds = array<i64: 2, 1, 1>, scalar_prefetch = 0 : i64, scratch_operands = 0 : i64, tpu.core_type = #tpu.core_type<tc>, window_params = [{transform_indices = @transform_0, window_bounds = array<i64: 1, 4, 2, 128>}, {transform_indices = @transform_1, window_bounds = array<i64: 1, 4, 2, 128>}, {transform_indices = @transform_2, window_bounds = array<i64: 1, 1, 2, 128>}]} {
    %c0_i32 = arith.constant 0 : i32
    %0 = arith.cmpi eq, %arg2, %c0_i32 : i32
    %1 = arith.extui %0 : i1 to i32
    %c0_i32_0 = arith.constant 0 : i32
    %2 = arith.cmpi ne, %1, %c0_i32_0 : i32
    scf.if %2 {
      %cst_35 = arith.constant 0.000000e+00 : f32
      %68 = vector.broadcast %cst_35 : f32 to vector<2x128xf32>
      %c0_36 = arith.constant 0 : index
      %c0_37 = arith.constant 0 : index
      %c0_38 = arith.constant 0 : index
      %c0_39 = arith.constant 0 : index
      %69 = vector.load %arg5[%c0_36, %c0_37, %c0_38, %c0_39] : memref<1x1x2x128xf32, #tpu.memory_space<vmem>>, vector<1x1x2x128xf32>
      %70 = vector.shape_cast %69 : vector<1x1x2x128xf32> to vector<2x128xf32>
      %71 = vector.shape_cast %68 : vector<2x128xf32> to vector<1x1x2x128xf32>
      tpu.vector_store %arg5[%c0_36, %c0_37, %c0_38, %c0_39], %71 {strides = array<i32>} : memref<1x1x2x128xf32, #tpu.memory_space<vmem>>, vector<1x1x2x128xf32>,
    } else {
    }
    %c0 = arith.constant 0 : index
    %c0_1 = arith.constant 0 : index
    %c0_2 = arith.constant 0 : index
    %c0_3 = arith.constant 0 : index
    %3 = vector.load %arg3[%c0, %c0_1, %c0_2, %c0_3] : memref<1x4x2x128xf32, #tpu.memory_space<vmem>>, vector<1x4x2x128xf32>
    %4 = vector.shape_cast %3 : vector<1x4x2x128xf32> to vector<4x2x128xf32>
    %c0_4 = arith.constant 0 : index
    %c0_5 = arith.constant 0 : index
    %c0_6 = arith.constant 0 : index
    %c0_7 = arith.constant 0 : index
    %5 = vector.load %arg4[%c0_4, %c0_5, %c0_6, %c0_7] : memref<1x4x2x128xf32, #tpu.memory_space<vmem>>, vector<1x4x2x128xf32>
    %6 = vector.shape_cast %5 : vector<1x4x2x128xf32> to vector<4x2x128xf32>
    %7 = arith.mulf %4, %6 : vector<4x2x128xf32>
    %cst = arith.constant dense<0.000000e+00> : vector<2x128xf32>
    %8 = vector.multi_reduction <add>, %7, %cst [0] : vector<4x2x128xf32> to vector<2x128xf32>
    %9 = arith.mulf %4, %4 : vector<4x2x128xf32>
    %cst_8 = arith.constant dense<0.000000e+00> : vector<2x128xf32>
    %10 = vector.multi_reduction <add>, %9, %cst_8 [0] : vector<4x2x128xf32> to vector<2x128xf32>
    %11 = arith.mulf %6, %6 : vector<4x2x128xf32>
    %cst_9 = arith.constant dense<0.000000e+00> : vector<2x128xf32>
    %12 = vector.multi_reduction <add>, %11, %cst_9 [0] : vector<4x2x128xf32> to vector<2x128xf32>
    %13 = arith.mulf %10, %12 : vector<2x128xf32>
    %14 = math.sqrt %13 : vector<2x128xf32>
    %cst_10 = arith.constant 9.99999996E-12 : f32
    %15 = vector.broadcast %cst_10 : f32 to vector<2x128xf32>
    %16 = arith.addf %14, %15 : vector<2x128xf32>
    %17 = tpu.reciprocal %16 {approx = true} : vector<2x128xf32> -> vector<2x128xf32>
    %18 = arith.mulf %16, %17 : vector<2x128xf32>
    %cst_11 = arith.constant 2.000000e+00 : f32
    %19 = vector.broadcast %cst_11 : f32 to vector<2x128xf32>
    %20 = arith.subf %19, %18 : vector<2x128xf32>
    %21 = arith.mulf %17, %20 : vector<2x128xf32>
    %cst_12 = arith.constant 9.99999996E-12 : f32
    %22 = vector.broadcast %cst_12 : f32 to vector<2x128xf32>
    %23 = arith.addf %8, %22 : vector<2x128xf32>
    %24 = arith.mulf %23, %21 : vector<2x128xf32>
    %25 = math.absf %24 : vector<2x128xf32>
    %cst_13 = arith.constant -0.0012624911 : f32
    %26 = vector.broadcast %cst_13 : f32 to vector<2x128xf32>
    %27 = arith.mulf %26, %25 : vector<2x128xf32>
    %cst_14 = arith.constant 6.670090e-03 : f32
    %28 = vector.broadcast %cst_14 : f32 to vector<2x128xf32>
    %29 = arith.addf %27, %28 : vector<2x128xf32>
    %30 = arith.mulf %29, %25 : vector<2x128xf32>
    %cst_15 = arith.constant -0.0170881264 : f32
    %31 = vector.broadcast %cst_15 : f32 to vector<2x128xf32>
    %32 = arith.addf %30, %31 : vector<2x128xf32>
    %33 = arith.mulf %32, %25 : vector<2x128xf32>
    %cst_16 = arith.constant 0.0308918804 : f32
    %34 = vector.broadcast %cst_16 : f32 to vector<2x128xf32>
    %35 = arith.addf %33, %34 : vector<2x128xf32>
    %36 = arith.mulf %35, %25 : vector<2x128xf32>
    %cst_17 = arith.constant -0.0501743034 : f32
    %37 = vector.broadcast %cst_17 : f32 to vector<2x128xf32>
    %38 = arith.addf %36, %37 : vector<2x128xf32>
    %39 = arith.mulf %38, %25 : vector<2x128xf32>
    %cst_18 = arith.constant 0.0889789909 : f32
    %40 = vector.broadcast %cst_18 : f32 to vector<2x128xf32>
    %41 = arith.addf %39, %40 : vector<2x128xf32>
    %42 = arith.mulf %41, %25 : vector<2x128xf32>
    %cst_19 = arith.constant -0.214598805 : f32
    %43 = vector.broadcast %cst_19 : f32 to vector<2x128xf32>
    %44 = arith.addf %42, %43 : vector<2x128xf32>
    %45 = arith.mulf %44, %25 : vector<2x128xf32>
    %cst_20 = arith.constant 1.57079625 : f32
    %46 = vector.broadcast %cst_20 : f32 to vector<2x128xf32>
    %47 = arith.addf %45, %46 : vector<2x128xf32>
    %cst_21 = arith.constant 1.000000e+00 : f32
    %48 = vector.broadcast %cst_21 : f32 to vector<2x128xf32>
    %49 = arith.subf %48, %25 : vector<2x128xf32>
    %cst_22 = arith.constant 0.000000e+00 : f32
    %50 = vector.broadcast %cst_22 : f32 to vector<2x128xf32>
    %51 = arith.maximumf %49, %50 : vector<2x128xf32>
    %52 = math.sqrt %51 : vector<2x128xf32>
    %53 = arith.mulf %52, %47 : vector<2x128xf32>
    %cst_23 = arith.constant 0.000000e+00 : f32
    %54 = vector.broadcast %cst_23 : f32 to vector<2x128xf32>
    %55 = arith.cmpf olt, %24, %54 : vector<2x128xf32>
    %cst_24 = arith.constant 3.14159274 : f32
    %56 = vector.broadcast %cst_24 : f32 to vector<2x128xf32>
    %57 = arith.subf %56, %53 : vector<2x128xf32>
    %58 = arith.select %55, %57, %53 : vector<2x128xi1>, vector<2x128xf32>
    %c0_25 = arith.constant 0 : index
    %c0_26 = arith.constant 0 : index
    %c0_27 = arith.constant 0 : index
    %c0_28 = arith.constant 0 : index
    %59 = vector.load %arg5[%c0_25, %c0_26, %c0_27, %c0_28] : memref<1x1x2x128xf32, #tpu.memory_space<vmem>>, vector<1x1x2x128xf32>
    %60 = vector.shape_cast %59 : vector<1x1x2x128xf32> to vector<2x128xf32>
    %61 = arith.addf %60, %58 : vector<2x128xf32>
    %c0_29 = arith.constant 0 : index
    %c0_30 = arith.constant 0 : index
    %c0_31 = arith.constant 0 : index
    %c0_32 = arith.constant 0 : index
    %62 = vector.load %arg5[%c0_29, %c0_30, %c0_31, %c0_32] : memref<1x1x2x128xf32, #tpu.memory_space<vmem>>, vector<1x1x2x128xf32>
    %63 = vector.shape_cast %62 : vector<1x1x2x128xf32> to vector<2x128xf32>
    %64 = vector.shape_cast %61 : vector<2x128xf32> to vector<1x1x2x128xf32>
    tpu.vector_store %arg5[%c0_29, %c0_30, %c0_31, %c0_32], %64 {strides = array<i32>} : memref<1x1x2x128xf32, #tpu.memory_space<vmem>>, vector<1x1x2x128xf32>,
    %c0_i32_33 = arith.constant 0 : i32
    %65 = arith.cmpi eq, %arg2, %c0_i32_33 : i32
    %66 = arith.extui %65 : i1 to i32
    %c0_i32_34 = arith.constant 0 : i32
    %67 = arith.cmpi ne, %66, %c0_i32_34 : i32
    scf.if %67 {
      %c0_35 = arith.constant 0 : index
      %c0_36 = arith.constant 0 : index
      %c0_37 = arith.constant 0 : index
      %c0_38 = arith.constant 0 : index
      %68 = vector.load %arg5[%c0_35, %c0_36, %c0_37, %c0_38] : memref<1x1x2x128xf32, #tpu.memory_space<vmem>>, vector<1x1x2x128xf32>
      %69 = vector.shape_cast %68 : vector<1x1x2x128xf32> to vector<2x128xf32>
      %cst_39 = arith.constant 0.223811641 : f32
      %70 = vector.broadcast %cst_39 : f32 to vector<2x128xf32>
      %71 = arith.mulf %69, %70 : vector<2x128xf32>
      %c0_40 = arith.constant 0 : index
      %c0_41 = arith.constant 0 : index
      %c0_42 = arith.constant 0 : index
      %c0_43 = arith.constant 0 : index
      %72 = vector.load %arg5[%c0_40, %c0_41, %c0_42, %c0_43] : memref<1x1x2x128xf32, #tpu.memory_space<vmem>>, vector<1x1x2x128xf32>
      %73 = vector.shape_cast %72 : vector<1x1x2x128xf32> to vector<2x128xf32>
      %74 = vector.shape_cast %71 : vector<2x128xf32> to vector<1x1x2x128xf32>
      tpu.vector_store %arg5[%c0_40, %c0_41, %c0_42, %c0_43], %74 {strides = array<i32>} : memref<1x1x2x128xf32, #tpu.memory_space<vmem>>, vector<1x1x2x128xf32>,
    } else {
    }
    return
  }
  func.func @transform_0(%arg0: i32, %arg1: i32, %arg2: i32) -> (i32, i32, i32, i32) {
    %c1_i32 = arith.constant 1 : i32
    %0 = arith.muli %arg1, %c1_i32 : i32
    %1 = arith.addi %0, %arg2 : i32
    %c0_i32 = arith.constant 0 : i32
    %2 = arith.minsi %1, %c0_i32 : i32
    %c0_i32_0 = arith.constant 0 : i32
    %c0_i32_1 = arith.constant 0 : i32
    %c0_i32_2 = arith.constant 0 : i32
    return %arg0, %c0_i32_0, %2, %c0_i32_1 : i32, i32, i32, i32
  }
  func.func @transform_1(%arg0: i32, %arg1: i32, %arg2: i32) -> (i32, i32, i32, i32) {
    %c1_i32 = arith.constant 1 : i32
    %0 = arith.muli %arg1, %c1_i32 : i32
    %1 = arith.addi %0, %arg2 : i32
    %c0_i32 = arith.constant 0 : i32
    %2 = arith.minsi %1, %c0_i32 : i32
    %c0_i32_0 = arith.constant 0 : i32
    %c0_i32_1 = arith.constant 0 : i32
    %c0_i32_2 = arith.constant 0 : i32
    return %arg0, %c0_i32_0, %2, %c0_i32_1 : i32, i32, i32, i32
  }
  func.func @transform_2(%arg0: i32, %arg1: i32, %arg2: i32) -> (i32, i32, i32, i32) {
    %c0_i32 = arith.constant 0 : i32
    %c0_i32_0 = arith.constant 0 : i32
    %c0_i32_1 = arith.constant 0 : i32
    return %arg0, %arg1, %c0_i32, %c0_i32_0 : i32, i32, i32, i32
  }
}

</mosaic_0001>

<bundles_post_ra>
// kernel: sam_loss_pallas.1
= control target key start
LH: loop header
LB: loop body
LE: loop exit
PB: predicated region body
PF: predicated region fallthrough
CT: control target
= control target key end

     0   :  { %s535_s9 = smov 0   ;;  %s537_s10 = smov 0   ;;  %s590_s0 = inlined_call_operand.vmem [shape: f32[2,4,2,128], index: 0, kind: input, shape index: {}]   ;;  %s591_s1 = inlined_call_operand.vmem [shape: f32[2,4,2,128], index: 1, kind: input, shape index: {}]   ;;  %s592_s2 = inlined_call_operand.vmem [shape: f32[2,1,2,128], index: 2, kind: output, shape index: {}]  }
   0x1   :  { %s539_s11 = smov 0  }
   0x2 LB: > { %s31_s12 = sadd.s32 1, %s513_s10  ;;  %p454_p0 = scmp.ge.s32.totalorder %s517_s11, 1  ;;  %s517_s11 = sphi %s539_s11, %s12_s11   ;;  %s513_s10 = sphi %s537_s10, %s594_s10   ;;  %s509_s9 = sphi %s535_s9, %s593_s9  }
   0x3   : > { %p33_p1 = scmp.ge.s32.totalorder %s31_s12, 2  ;;  %p177_p2 = scmp.lt.s32.totalorder %s517_s11, 3 }
   0x5   : > { %s596_s12 = smov (%p33_p1, %s31_s12), 0  ;;  %p178_p3 = pnand %p454_p0, %p177_p2 }
   0x6   : > { %p221_p4 = scmp.lt.s32.totalorder (!%p178_p3), %s509_s9, 1 }
   0x7   : > { %181 = sbr.rel (%p178_p3) target bundleno = 119 (0x77), region = 28 }
   0xc   : > { %s598_s9 = smov (!%p221_p4, %s509_s9), 1  ;;  %vm270_vm0 = vcmask 1041408   ;;  %v519_v3 = vmov 0.0  }
   0xd   : > { %s462_s13 = sshll.u32 %s598_s9, 3  ;;  %s459_s14 = sshll.u32 %s598_s9, 1 }
   0xe   : > { %s228_s17 = scalar_lea.vmem %s590_s0, %s462_s13  ;;  %s242_s20 = scalar_lea.vmem %s591_s1, %s462_s13 }
   0xf   : > { %s562_s23 = scalar_lea.vmem %s592_s2, %s459_s14  ;;  %v258_v0 = vld [vmem:[%s228_s17] sm:$0x3]  ;;  %v259_v1 = vld [vmem:[%s228_s17 + $0x2] sm:$0x3]  ;;  %v260_v2 = vld [vmem:[%s228_s17 + $0x4] sm:$0x3] }
  0x10   : > { %257 = vst [vmem:[%s562_s23] sm:$0x3] %v519_v3  ;;  %v261_v4 = vld [vmem:[%s228_s17 + $0x6] sm:$0x3]  ;;  %v262_v5 = vld [vmem:[%s242_s20] sm:$0x3]  ;;  %v278_v6 = vmul.f32 %v258_v0, %v258_v0  ;;  %v279_v7 = vmul.f32 %v259_v1, %v259_v1  ;;  %v280_v8 = vmul.f32 %v260_v2, %v260_v2 }
  0x11   : > { %v263_v9 = vld [vmem:[%s242_s20 + $0x2] sm:$0x3]  ;;  %v264_v10 = vld [vmem:[%s242_s20 + $0x4] sm:$0x3]  ;;  %v265_v11 = vld [vmem:[%s242_s20 + $0x6] sm:$0x3]  ;;  %v289_v12 = vmul.f32 %v262_v5, %v262_v5  ;;  %v281_v13 = vmul.f32 %v261_v4, %v261_v4  ;;  %v266_v36 = vmul.f32 %v262_v5, %v258_v0 }
  0x12   : > { %v282_v14 = vsel %vm270_vm0, %v278_v6, 0.0  ;;  %v283_v15 = vsel %vm270_vm0, %v279_v7, 0.0  ;;  %v285_v17 = vsel %vm270_vm0, %v280_v8, 0.0  ;;  %v290_v18 = vmul.f32 %v263_v9, %v263_v9 }
  0x13   : > { %v284_v16 = vadd.f32 %v283_v15, %v282_v14  ;;  %v291_v19 = vmul.f32 %v264_v10, %v264_v10  ;;  %v292_v20 = vmul.f32 %v265_v11, %v265_v11  ;;  %v293_v22 = vsel %vm270_vm0, %v289_v12, 0.0 }
  0x14   : > { %v287_v23 = vsel %vm270_vm0, %v281_v13, 0.0  ;;  %v294_v24 = vsel %vm270_vm0, %v290_v18, 0.0  ;;  %v267_v37 = vmul.f32 %v263_v9, %v259_v1  ;;  %v268_v40 = vmul.f32 %v264_v10, %v260_v2 }
  0x15   : > { %v286_v21 = vadd.f32 %v285_v17, %v284_v16  ;;  %v296_v25 = vsel %vm270_vm0, %v291_v19, 0.0  ;;  %v295_v26 = vadd.f32 %v294_v24, %v293_v22  ;;  %v298_v27 = vsel %vm270_vm0, %v292_v20, 0.0 }
  0x16   : > { %v271_v41 = vsel %vm270_vm0, %v266_v36, 0.0  ;;  %v272_v42 = vsel %vm270_vm0, %v267_v37, 0.0  ;;  %v269_v44 = vmul.f32 %v265_v11, %v261_v4  ;;  %v274_v45 = vsel %vm270_vm0, %v268_v40, 0.0 }
  0x17   : > { %v288_v28 = vadd.f32 %v287_v23, %v286_v21  ;;  %v297_v29 = vadd.f32 %v296_v25, %v295_v26  ;;  %v273_v43 = vadd.f32 %v272_v42, %v271_v41  ;;  %v343_v15 = vld [vmem:[%s562_s23] sm:$0x3] }
  0x18   : > { %v276_v47 = vsel %vm270_vm0, %v269_v44, 0.0 }
  0x19   : > { %v299_v30 = vadd.f32 %v298_v27, %v297_v29  ;;  %v275_v46 = vadd.f32 %v274_v45, %v273_v43 }
  0x1b   : > { %v300_v31 = vmul.f32 %v299_v30, %v288_v28  ;;  %v277_v48 = vadd.f32 %v276_v47, %v275_v46 }
  0x1d   : > { %489 = vrsqrt.f32 %v300_v31  ;;  %vm303_vm1 = vcmp.eq.f32.partialorder %v300_v31, inf  ;;  %v306_v33 = vand.u32 2147483648, %v300_v31  ;;  %vm305_vm2 = vcmp.eq.f32.partialorder %v300_v31, 0.0 }
  0x1e   : > { %v313_v52 = vadd.f32 1e-11, %v277_v48 }
  0x2a   : > { %v490_v32 = vpop.eup %489 }
  0x2b   : > { %v302_v34 = vmul.f32 %v490_v32, %v300_v31 }
  0x2d   : > { %v304_v35 = vsel %vm303_vm1, %v300_v31, %v302_v34 }
  0x2e   : > { %v307_v38 = vsel %vm305_vm2, %v306_v33, %v304_v35 }
  0x2f   : > { %v308_v39 = vadd.f32 1e-11, %v307_v38 }
  0x31   : > { %491 = vrcp.f32 %v308_v39 }
  0x3e   : > { %v492_v49 = vpop.eup %491 }
  0x3f   : > { %v310_v50 = vmul.f32 %v492_v49, %v308_v39 }
  0x41   : > { %v311_v51 = vsub.f32 2.0, %v310_v50 }
  0x43   : > { %v312_v53 = vmul.f32 %v492_v49, %v311_v51 }
  0x45   : > { %v314_v54 = vmul.f32 %v313_v52, %v312_v53 }
  0x47   : > { %v315_v55 = vand.u32 2147483647, %v314_v54  ;;  %vm340_vm5 = vcmp.lt.f32.partialorder %v314_v54, 0.0 }
  0x49   : > { %v316_v56 = vmul.f32 -0.0012624911, %v315_v55  ;;  %v330_v57 = vsub.f32 1.0, %v315_v55 }
  0x4b   : > { %v317_v58 = vadd.f32 0.00667009, %v316_v56  ;;  %v331_v59 = vmax.f32 %v330_v57, 0.0 }
  0x4d   : > { %v318_v60 = vmul.f32 %v317_v58, %v315_v55  ;;  %493 = vrsqrt.f32 %v331_v59  ;;  %vm334_vm3 = vcmp.eq.f32.partialorder %v331_v59, inf  ;;  %v337_v7 = vand.u32 2147483648, %v331_v59 }
  0x4e   : > { %vm336_vm4 = vcmp.eq.f32.partialorder %v331_v59, 0.0 }
  0x4f   : > { %v319_v61 = vadd.f32 -0.017088126, %v318_v60 }
  0x51   : > { %v320_v62 = vmul.f32 %v319_v61, %v315_v55 }
  0x53   : > { %v321_v63 = vadd.f32 0.03089188, %v320_v62 }
  0x55   : > { %v322_v0 = vmul.f32 %v321_v63, %v315_v55 }
  0x57   : > { %v323_v1 = vadd.f32 -0.050174303, %v322_v0 }
  0x59   : > { %v324_v2 = vmul.f32 %v323_v1, %v315_v55 }
  0x5a   : > { %v494_v3 = vpop.eup %493 }
  0x5b   : > { %v325_v4 = vadd.f32 0.08897899, %v324_v2  ;;  %v333_v5 = vmul.f32 %v494_v3, %v331_v59 }
  0x5d   : > { %v326_v6 = vmul.f32 %v325_v4, %v315_v55  ;;  %v335_v9 = vsel %vm334_vm3, %v331_v59, %v333_v5 }
  0x5e   : > { %v338_v11 = vsel %vm336_vm4, %v337_v7, %v335_v9 }
  0x5f   : > { %v327_v8 = vadd.f32 -0.2145988, %v326_v6 }
  0x61   : > { %v328_v10 = vmul.f32 %v327_v8, %v315_v55 }
  0x63   : > { %v329_v12 = vadd.f32 1.5707963, %v328_v10 }
  0x65   : > { %v339_v13 = vmul.f32 %v338_v11, %v329_v12 }
  0x67   : > { %v341_v14 = vsub.f32 3.1415927, %v339_v13 }
  0x69   : > { %v342_v16 = vsel %vm340_vm5, %v341_v14, %v339_v13 }
  0x6a   : > { %v344_v17 = vadd.f32 %v343_v15, %v342_v16 }
  0x6c   : > { %345 = vst [vmem:[%s562_s23] sm:$0x3] %v344_v17 }
  0x73   : > { %v349_v18 = vld [vmem:[%s562_s23] sm:$0x3] }
  0x74   : > { %v350_v19 = vmul.f32 0.22381164, %v349_v18 }
  0x76   : > { %351 = vst [vmem:[%s562_s23] sm:$0x3] %v350_v19 }
  0x77 PF: > { %s12_s11 = sadd.s32 1, %s517_s11   ;;  %s593_s9 = smov %s513_s10 }
  0x78   : > { %p9_p5 = scmp.ge.s32.totalorder %s12_s11, 4   ;;  %s594_s10 = smov %s596_s12 }
  0x7a   :  { %11 = sbr.rel (!%p9_p5) target bundleno = 2 (0x2), region = 69 }

</bundles_post_ra>
